<compile_context>
chip_gen: v5e
topology: v5e:2x2
jax: 0.10.0
libtpu: 0.0.40
codegen_flags: <defaults>
</compile_context>

<pallas_src>
import functools
import numpy as np
import jax
import jax.numpy as jnp
from jax.experimental import pallas as pl
from jax.experimental.pallas import tpu as pltpu

WINDOW_SIZE = 11   # pytorch_ssim default
SIGMA = 1.5        # pytorch_ssim default
ALPHA = 0.9


def _gaussian_1d():
    # Deterministic "parameter" of pytorch_ssim.SSIM: normalized 1D gaussian.
    x = np.arange(WINDOW_SIZE, dtype=np.float64) - WINDOW_SIZE // 2
    g = np.exp(-(x ** 2) / (2.0 * SIGMA ** 2))
    g = g / g.sum()
    return g.astype(np.float32)


def _conv_matrix(n):
    # Banded matrix M (n, n) such that (M @ x) == "same" conv of x with the 1D
    # gaussian and zero padding (taps falling outside [0, n) are dropped).
    w = _gaussian_1d()
    pad = WINDOW_SIZE // 2
    m = np.zeros((n, n), np.float32)
    for i in range(n):
        for k in range(WINDOW_SIZE):
            j = i + k - pad
            if 0 <= j < n:
                m[i, j] = w[k]
    return m


def _loss_kernel(gh_ref, gw_ref, x1_ref, x2_ref, out_ref, *, H, W):
    x1 = x1_ref[0]            # (H, W)
    x2 = x2_ref[0]            # (H, W)
    gh = gh_ref[...]          # (H, H): blur_H(x) = gh @ x
    gw = gw_ref[...]          # (W, W): blur_W(x) = x @ gw

    # Stack the five blur inputs along sublanes -> one MXU matmul for the W pass.
    stacked = jnp.concatenate([x1, x2, x1 * x1, x2 * x2, x1 * x2], axis=0)  # (5H, W)
    tw = jnp.dot(stacked, gw, preferred_element_type=jnp.float32)           # (5H, W)

    def hpass(k):  # H pass for slice k: (H, H) @ (H, W) on the MXU
        return jnp.dot(gh, tw[k * H:(k + 1) * H, :],
                       preferred_element_type=jnp.float32)

    mu1 = hpass(0)
    mu2 = hpass(1)
    e11 = hpass(2)
    e22 = hpass(3)
    e12 = hpass(4)

    mu1_sq = mu1 * mu1
    mu2_sq = mu2 * mu2
    mu1_mu2 = mu1 * mu2
    sigma1_sq = e11 - mu1_sq
    sigma2_sq = e22 - mu2_sq
    sigma12 = e12 - mu1_mu2

    C1 = 0.01 ** 2
    C2 = 0.03 ** 2
    ssim_map = ((2.0 * mu1_mu2 + C1) * (2.0 * sigma12 + C2)) / (
        (mu1_sq + mu2_sq + C1) * (sigma1_sq + sigma2_sq + C2))

    diff = x1 - x2
    ssim_s = jnp.sum(ssim_map, axis=(0, 1), keepdims=True)    # (1, 1)
    mse_s = jnp.sum(diff * diff, axis=(0, 1), keepdims=True)  # (1, 1)

    # Lane-dense partial-sum row: row 0 = ssim partial, row 1 = mse partial.
    out_ref[0] = jnp.concatenate(
        [jnp.broadcast_to(ssim_s, (1, 128)),
         jnp.broadcast_to(mse_s, (1, 128))], axis=0)          # (2, 128)


def mse_and_ssim_loss(img1, img2, alpha=ALPHA):
    B, C, H, W = img1.shape
    BC = B * C
    x1 = img1.astype(jnp.float32).reshape(BC, H, W)
    x2 = img2.astype(jnp.float32).reshape(BC, H, W)
    gh = jnp.asarray(_conv_matrix(H))        # (H, H)
    gw = jnp.asarray(_conv_matrix(W).T)      # (W, W)

    kernel = functools.partial(_loss_kernel, H=H, W=W)
    partials = pl.pallas_call(
        kernel,
        out_shape=jax.ShapeDtypeStruct((BC, 2, 128), jnp.float32),
        grid=(BC,),
        in_specs=[
            pl.BlockSpec((H, H), lambda i: (0, 0)),       # gh (resident across grid)
            pl.BlockSpec((W, W), lambda i: (0, 0)),       # gw (resident across grid)
            pl.BlockSpec((1, H, W), lambda i: (i, 0, 0)),  # x1 block
            pl.BlockSpec((1, H, W), lambda i: (i, 0, 0)),  # x2 block
        ],
        out_specs=pl.BlockSpec((1, 2, 128), lambda i: (i, 0, 0)),
        compiler_params=pltpu.CompilerParams(
            dimension_semantics=("parallel",),
            vmem_limit_bytes=32 * 1024 * 1024,
        ),
    )(gh, gw, x1, x2)

    n = float(B * C * H * W)
    ssim_mean = jnp.sum(partials[:, 0, 0]) / n
    mse_mean = jnp.sum(partials[:, 1, 0]) / n
    return alpha * mse_mean + (1.0 - alpha) * (1.0 - ssim_mean)


def _ref_loss_numpy(img1, img2, alpha=ALPHA):
    # Pure-numpy reference reproducing PyTorch semantics (MSELoss + pytorch_ssim.SSIM).
    img1 = np.asarray(img1, np.float64)
    img2 = np.asarray(img2, np.float64)
    w = np.asarray(_gaussian_1d(), np.float64)
    pad = WINDOW_SIZE // 2

    def blur(x):
        xp = np.pad(x, ((0, 0), (0, 0), (pad, pad), (pad, pad)))
        B, C, Hp, Wp = xp.shape
        H, W = Hp - 2 * pad, Wp - 2 * pad
        tmp = np.zeros((B, C, Hp, W))
        for k in range(WINDOW_SIZE):
            tmp += w[k] * xp[:, :, :, k:k + W]
        out = np.zeros((B, C, H, W))
        for k in range(WINDOW_SIZE):
            out += w[k] * tmp[:, :, k:k + H, :]
        return out

    mu1, mu2 = blur(img1), blur(img2)
    s11 = blur(img1 * img1) - mu1 * mu1
    s22 = blur(img2 * img2) - mu2 * mu2
    s12 = blur(img1 * img2) - mu1 * mu2
    C1, C2 = 0.01 ** 2, 0.03 ** 2
    ssim = np.mean(((2 * mu1 * mu2 + C1) * (2 * s12 + C2)) /
                   ((mu1 * mu1 + mu2 * mu2 + C1) * (s11 + s22 + C2)))
    mse = np.mean((img1 - img2) ** 2)
    return alpha * mse + (1 - alpha) * (1 - ssim)


if __name__ == "__main__":
    key = jax.random.PRNGKey(0)
    k1, k2 = jax.random.split(key)
    img1 = jax.random.uniform(k1, (2, 4, 16, 16), dtype=jnp.float32)
    img2 = jax.random.uniform(k2, (2, 4, 16, 16), dtype=jnp.float32)

    loss = jax.block_until_ready(mse_and_ssim_loss(img1, img2))
    ref = _ref_loss_numpy(np.asarray(img1), np.asarray(img2))
    # Tolerance accounts for TPU MXU default precision (f32 operands may go
    # through bf16 passes) in the Gaussian-blur matmuls; loss is O(0.25).
    assert abs(float(loss) - float(ref)) < 2e-3, (float(loss), float(ref))
    print("KERNEL_OK")
</pallas_src>

<mosaic_0001>
module attributes {stable_mosaic.version = 11 : i64} {
  func.func @_loss_kernel(%arg0: i32, %arg1: memref<16x16xf32, #tpu.memory_space<vmem>>, %arg2: memref<16x16xf32, #tpu.memory_space<vmem>>, %arg3: memref<1x16x16xf32, #tpu.memory_space<vmem>>, %arg4: memref<1x16x16xf32, #tpu.memory_space<vmem>>, %arg5: memref<1x2x128xf32, #tpu.memory_space<vmem>>) attributes {dimension_semantics = [#tpu.dimension_semantics<parallel>], iteration_bounds = array<i64: 8>, scalar_prefetch = 0 : i64, scratch_operands = 0 : i64, tpu.core_type = #tpu.core_type<tc>, window_params = [{pipeline_mode = #tpu.pipeline_mode<synchronous>, transform_indices = @transform_0, window_bounds = array<i64: 16, 16>}, {pipeline_mode = #tpu.pipeline_mode<synchronous>, transform_indices = @transform_1, window_bounds = array<i64: 16, 16>}, {transform_indices = @transform_2, window_bounds = array<i64: 1, 16, 16>}, {transform_indices = @transform_3, window_bounds = array<i64: 1, 16, 16>}, {transform_indices = @transform_4, window_bounds = array<i64: 1, 2, 128>}]} {
    %c0 = arith.constant 0 : index
    %c0_0 = arith.constant 0 : index
    %c0_1 = arith.constant 0 : index
    %0 = vector.load %arg3[%c0, %c0_0, %c0_1] : memref<1x16x16xf32, #tpu.memory_space<vmem>>, vector<1x16x16xf32>
    %1 = vector.shape_cast %0 : vector<1x16x16xf32> to vector<16x16xf32>
    %c0_2 = arith.constant 0 : index
    %c0_3 = arith.constant 0 : index
    %c0_4 = arith.constant 0 : index
    %2 = vector.load %arg4[%c0_2, %c0_3, %c0_4] : memref<1x16x16xf32, #tpu.memory_space<vmem>>, vector<1x16x16xf32>
    %3 = vector.shape_cast %2 : vector<1x16x16xf32> to vector<16x16xf32>
    %c0_5 = arith.constant 0 : index
    %c0_6 = arith.constant 0 : index
    %4 = vector.load %arg1[%c0_5, %c0_6] : memref<16x16xf32, #tpu.memory_space<vmem>>, vector<16x16xf32>
    %c0_7 = arith.constant 0 : index
    %c0_8 = arith.constant 0 : index
    %5 = vector.load %arg2[%c0_7, %c0_8] : memref<16x16xf32, #tpu.memory_space<vmem>>, vector<16x16xf32>
    %6 = arith.mulf %1, %1 : vector<16x16xf32>
    %7 = arith.mulf %3, %3 : vector<16x16xf32>
    %8 = arith.mulf %1, %3 : vector<16x16xf32>
    %9 = tpu.concatenate %1, %3, %6, %7, %8 in 0 : vector<16x16xf32>, vector<16x16xf32>, vector<16x16xf32>, vector<16x16xf32>, vector<16x16xf32> -> vector<80x16xf32>
    %cst = arith.constant dense<0.000000e+00> : vector<80x16xf32>
    %10 = tpu.matmul %9, %5, %cst {dimension_numbers = #tpu.dot_dimension_numbers<[1], [0], [0], [1], [0, 0, 1, 1], [], []>} : vector<80x16xf32>, vector<16x16xf32>, vector<80x16xf32> -> vector<80x16xf32>
    %11 = vector.extract_strided_slice %10 {offsets = [0, 0], sizes = [16, 16], strides = [1, 1]} : vector<80x16xf32> to vector<16x16xf32>
    %cst_9 = arith.constant dense<0.000000e+00> : vector<16x16xf32>
    %12 = tpu.matmul %4, %11, %cst_9 {dimension_numbers = #tpu.dot_dimension_numbers<[1], [0], [0], [1], [0, 0, 1, 1], [], []>} : vector<16x16xf32>, vector<16x16xf32>, vector<16x16xf32> -> vector<16x16xf32>
    %13 = vector.extract_strided_slice %10 {offsets = [16, 0], sizes = [16, 16], strides = [1, 1]} : vector<80x16xf32> to vector<16x16xf32>
    %cst_10 = arith.constant dense<0.000000e+00> : vector<16x16xf32>
    %14 = tpu.matmul %4, %13, %cst_10 {dimension_numbers = #tpu.dot_dimension_numbers<[1], [0], [0], [1], [0, 0, 1, 1], [], []>} : vector<16x16xf32>, vector<16x16xf32>, vector<16x16xf32> -> vector<16x16xf32>
    %15 = vector.extract_strided_slice %10 {offsets = [32, 0], sizes = [16, 16], strides = [1, 1]} : vector<80x16xf32> to vector<16x16xf32>
    %cst_11 = arith.constant dense<0.000000e+00> : vector<16x16xf32>
    %16 = tpu.matmul %4, %15, %cst_11 {dimension_numbers = #tpu.dot_dimension_numbers<[1], [0], [0], [1], [0, 0, 1, 1], [], []>} : vector<16x16xf32>, vector<16x16xf32>, vector<16x16xf32> -> vector<16x16xf32>
    %17 = vector.extract_strided_slice %10 {offsets = [48, 0], sizes = [16, 16], strides = [1, 1]} : vector<80x16xf32> to vector<16x16xf32>
    %cst_12 = arith.constant dense<0.000000e+00> : vector<16x16xf32>
    %18 = tpu.matmul %4, %17, %cst_12 {dimension_numbers = #tpu.dot_dimension_numbers<[1], [0], [0], [1], [0, 0, 1, 1], [], []>} : vector<16x16xf32>, vector<16x16xf32>, vector<16x16xf32> -> vector<16x16xf32>
    %19 = vector.extract_strided_slice %10 {offsets = [64, 0], sizes = [16, 16], strides = [1, 1]} : vector<80x16xf32> to vector<16x16xf32>
    %cst_13 = arith.constant dense<0.000000e+00> : vector<16x16xf32>
    %20 = tpu.matmul %4, %19, %cst_13 {dimension_numbers = #tpu.dot_dimension_numbers<[1], [0], [0], [1], [0, 0, 1, 1], [], []>} : vector<16x16xf32>, vector<16x16xf32>, vector<16x16xf32> -> vector<16x16xf32>
    %21 = arith.mulf %12, %12 : vector<16x16xf32>
    %22 = arith.mulf %14, %14 : vector<16x16xf32>
    %23 = arith.mulf %12, %14 : vector<16x16xf32>
    %24 = arith.subf %16, %21 : vector<16x16xf32>
    %25 = arith.subf %18, %22 : vector<16x16xf32>
    %26 = arith.subf %20, %23 : vector<16x16xf32>
    %cst_14 = arith.constant 2.000000e+00 : f32
    %27 = vector.broadcast %cst_14 : f32 to vector<16x16xf32>
    %28 = arith.mulf %27, %23 : vector<16x16xf32>
    %cst_15 = arith.constant 9.99999974E-5 : f32
    %29 = vector.broadcast %cst_15 : f32 to vector<16x16xf32>
    %30 = arith.addf %28, %29 : vector<16x16xf32>
    %cst_16 = arith.constant 2.000000e+00 : f32
    %31 = vector.broadcast %cst_16 : f32 to vector<16x16xf32>
    %32 = arith.mulf %31, %26 : vector<16x16xf32>
    %cst_17 = arith.constant 8.99999984E-4 : f32
    %33 = vector.broadcast %cst_17 : f32 to vector<16x16xf32>
    %34 = arith.addf %32, %33 : vector<16x16xf32>
    %35 = arith.mulf %30, %34 : vector<16x16xf32>
    %36 = arith.addf %21, %22 : vector<16x16xf32>
    %cst_18 = arith.constant 9.99999974E-5 : f32
    %37 = vector.broadcast %cst_18 : f32 to vector<16x16xf32>
    %38 = arith.addf %36, %37 : vector<16x16xf32>
    %39 = arith.addf %24, %25 : vector<16x16xf32>
    %cst_19 = arith.constant 8.99999984E-4 : f32
    %40 = vector.broadcast %cst_19 : f32 to vector<16x16xf32>
    %41 = arith.addf %39, %40 : vector<16x16xf32>
    %42 = arith.mulf %38, %41 : vector<16x16xf32>
    %43 = arith.divf %35, %42 : vector<16x16xf32>
    %44 = arith.subf %1, %3 : vector<16x16xf32>
    %45 = vector.shape_cast %43 : vector<16x16xf32> to vector<1x16x16xf32>
    %cst_20 = arith.constant dense<0.000000e+00> : vector<1xf32>
    %46 = vector.multi_reduction <add>, %45, %cst_20 [1, 2] : vector<1x16x16xf32> to vector<1xf32>
    %47 = vector.shape_cast %46 : vector<1xf32> to vector<1x1x1xf32>
    %48 = vector.extract %47[0, 0, 0] : f32 from vector<1x1x1xf32>
    %49 = vector.broadcast %48 : f32 to vector<1x1xf32>
    %50 = arith.mulf %44, %44 : vector<16x16xf32>
    %51 = vector.shape_cast %50 : vector<16x16xf32> to vector<1x16x16xf32>
    %cst_21 = arith.constant dense<0.000000e+00> : vector<1xf32>
    %52 = vector.multi_reduction <add>, %51, %cst_21 [1, 2] : vector<1x16x16xf32> to vector<1xf32>
    %53 = vector.shape_cast %52 : vector<1xf32> to vector<1x1x1xf32>
    %54 = vector.extract %53[0, 0, 0] : f32 from vector<1x1x1xf32>
    %55 = vector.broadcast %54 : f32 to vector<1x1xf32>
    %56 = vector.shape_cast %49 : vector<1x1xf32> to vector<1x1xf32>
    %57 = vector.broadcast %56 : vector<1x1xf32> to vector<1x128xf32>
    %58 = vector.shape_cast %55 : vector<1x1xf32> to vector<1x1xf32>
    %59 = vector.broadcast %58 : vector<1x1xf32> to vector<1x128xf32>
    %60 = tpu.concatenate %57, %59 in 0 : vector<1x128xf32>, vector<1x128xf32> -> vector<2x128xf32>
    %c0_22 = arith.constant 0 : index
    %c0_23 = arith.constant 0 : index
    %c0_24 = arith.constant 0 : index
    %61 = vector.load %arg5[%c0_22, %c0_23, %c0_24] : memref<1x2x128xf32, #tpu.memory_space<vmem>>, vector<1x2x128xf32>
    %62 = vector.shape_cast %61 : vector<1x2x128xf32> to vector<2x128xf32>
    %63 = vector.shape_cast %60 : vector<2x128xf32> to vector<1x2x128xf32>
    tpu.vector_store %arg5[%c0_22, %c0_23, %c0_24], %63 {strides = array<i32>} : memref<1x2x128xf32, #tpu.memory_space<vmem>>, vector<1x2x128xf32>,
    return
  }
  func.func @transform_0(%arg0: i32) -> (i32, i32) {
    %c0_i32 = arith.constant 0 : i32
    %c0_i32_0 = arith.constant 0 : i32
    %c0_i32_1 = arith.constant 0 : i32
    return %c0_i32, %c0_i32_0 : i32, i32
  }
  func.func @transform_1(%arg0: i32) -> (i32, i32) {
    %c0_i32 = arith.constant 0 : i32
    %c0_i32_0 = arith.constant 0 : i32
    %c0_i32_1 = arith.constant 0 : i32
    return %c0_i32, %c0_i32_0 : i32, i32
  }
  func.func @transform_2(%arg0: i32) -> (i32, i32, i32) {
    %c0_i32 = arith.constant 0 : i32
    %c0_i32_0 = arith.constant 0 : i32
    %c0_i32_1 = arith.constant 0 : i32
    return %arg0, %c0_i32, %c0_i32_0 : i32, i32, i32
  }
  func.func @transform_3(%arg0: i32) -> (i32, i32, i32) {
    %c0_i32 = arith.constant 0 : i32
    %c0_i32_0 = arith.constant 0 : i32
    %c0_i32_1 = arith.constant 0 : i32
    return %arg0, %c0_i32, %c0_i32_0 : i32, i32, i32
  }
  func.func @transform_4(%arg0: i32) -> (i32, i32, i32) {
    %c0_i32 = arith.constant 0 : i32
    %c0_i32_0 = arith.constant 0 : i32
    %c0_i32_1 = arith.constant 0 : i32
    return %arg0, %c0_i32, %c0_i32_0 : i32, i32, i32
  }
}

</mosaic_0001>

<bundles_post_ra>
// kernel: tpu_custom_call.1
= control target key start
LH: loop header
LB: loop body
LE: loop exit
PB: predicated region body
PF: predicated region fallthrough
CT: control target
= control target key end

     0   :  { %s1325_s0 = inlined_call_operand.hbm [shape: f32[16,16], index: 0, kind: input, shape index: {}]   ;;  %s1326_s1 = inlined_call_operand.hbm [shape: f32[16,16], index: 1, kind: input, shape index: {}]   ;;  %s1327_s2 = inlined_call_operand.hbm [shape: f32[8,16,16], index: 2, kind: input, shape index: {}]   ;;  %s1328_s3 = inlined_call_operand.hbm [shape: f32[8,16,16], index: 3, kind: input, shape index: {}]   ;;  %s1329_s4 = inlined_call_operand.hbm [shape: f32[8,2,128], index: 4, kind: output, shape index: {}]  }
   0x1   :  { %1336 = sst [smem:[#allocation15_spill]] %s1325_s0 }
   0x2   :  { %1337 = sst [smem:[#allocation16_spill]] %s1326_s1 }
   0x3   :  { %1338 = sst [smem:[#allocation17_spill]] %s1327_s2 }
   0x4   :  { %9 = vsyncpa [#allocation3], 0 }
   0x5   :  { %10 = vsyncpa [#allocation6], 0 }
   0x6   :  { %11 = vsyncpa [#allocation4], 0 }
   0x7   :  { %13 = vsyncpa [#allocation4 + $0x1], 0  ;;  %s1077_s15 = smov 0   ;;  %s1079_s16 = smov 0  }
   0x8   :  { %s1081_s17 = smov 0   ;;  %s1083_s18 = smov 0  }
   0x9 LB: > { %s1098_s19 = sadd.s32 4294967295, %s1046_s18   ;;  %s721_s20 = sadd.s32 4294967294, %s1046_s18   ;;  %s1046_s18 = sphi %s1083_s18, %s1360_s18   ;;  %s1042_s17 = sphi %s1081_s17, %s1359_s17   ;;  %s1038_s16 = sphi %s1079_s16, %s1358_s16   ;;  %s1034_s15 = sphi %s1077_s15, %s1357_s15  }
   0xa   : > { %p81_p0 = scmp.ne.s32.totalorder %s1038_s16, %s1034_s15  ;;  %p1335_p1 = scmp.eq.s32.totalorder %s1098_s19, 0 }
   0xb   : > { %p131_p2 = scmp.eq.s32.totalorder %s1098_s19, 7  ;;  %p137_p3 = scmp.eq.s32.totalorder %s721_s20, 7 }
   0xc   : > { %p1107_p4 = por %p1335_p1, %p81_p0  ;;  %p722_p5 = scmp.ge.s32.totalorder %s1046_s18, 1 }
   0xd   : > { %p1112_p6 = por %p137_p3, %p81_p0  ;;  %p144_p7 = scmp.lt.s32.totalorder %s1046_s18, 9 }
   0xe   : > { %s1341_s0 = sld [smem:[#allocation15_spill]]  ;;  %s1048_s27 = smov [#allocation2]  }
   0xf   : > { %p1120_p8 = pnand %p722_p5, %p144_p7  ;;  %s157_s28 = sshll.u32 %s1048_s27, 4  ;;  %s158_s28 = int_to_ptr.vmem [resolvable:$true] %s157_s28 }
  0x10   : > { %s1133_s30 = sadd.s32 1, %s1046_s18   ;;  %s1330_s5 = smov 128  }
  0x11   : > { %p788_p9 = pneg %p1120_p8  ;;  %s1332_s6 = smov 8  }
  0x12   : > { %s65_s7 = ssub.s32 %s1046_s18, %s1133_s30  ;;  %s68_s8 = sadd.s32 1, %s1042_s17 }
  0x13   : > { %p1128_p10 = pnand %p788_p9, %p1335_p1  ;;  %p66_p11 = scmp.eq.s32.totalorder %s65_s7, 0 }
  0x14   : > { %s155_s25 = sshll.u32 %s1341_s0, 4  ;;  %p75_p12 = scmp.ne.s32.totalorder %s1042_s17, %s1038_s16  ;;  %s156_s25 = int_to_ptr.hbm [resolvable:$true] %s155_s25 }
  0x15   : > { %791 = dma.hbm_to_vmem [thread:$0]  (!%p1128_p10), %s156_s25, 256, %s158_s28, [#allocation3], %s1330_s5, %s1330_s5, %s1332_s6  }
  0x16   : > { %p76_p13 = scmp.eq.s32.totalorder %s1046_s18, 0  ;;  %p808_p0 = scmp.lt.s32.totalorder %s1046_s18, 8 }
  0x17   : > { %s1148_s9 = scalar_select %p66_p11, %s1042_s17, %s68_s8  }
  0x18   : > { %p77_p3 = por %p76_p13, %p75_p12  ;;  %p1152_p5 = por %p131_p2, %p75_p12 }
  0x19   : > { %1344 = sst [smem:[#allocation14_spill]] %s1148_s9  ;;  %s185_s11 = sand.u32 1, %s1046_s18  }
  0x1a   : > { %s187_s12 = sand.u32 1, %s1042_s17   ;;  %s1334_s14 = sshll.u32 %s1046_s18, 4 }
  0x1b   : > { %s1158_s13 = sshll.u32 %s187_s12, 4  ;;  %s1346_s2 = sld [smem:[#allocation17_spill]] }
  0x1c   : > { %s189_s25 = scalar_lea.vmem [#allocation7], %s1158_s13  ;;  %p1169_p2 = pnand %p808_p0, %p77_p3 }
  0x1d   : > { %s197_s27 = sshll.u32 %s189_s25, 4  ;;  %s1348_s1 = sld [smem:[#allocation16_spill]]  ;;  %s198_s27 = int_to_ptr.vmem [resolvable:$true] %s197_s27 }
  0x1e   : > { %s1176_s6 = scalar_lea.sflag [#allocation3], %s185_s11  ;;  %p886_p9 = pneg %p1169_p2 }
  0x21   : > { %s194_s24 = scalar_lea.hbm %s1346_s2, %s1334_s14  ;;  %s889_s8 = scalar_lea.hbm %s1346_s2, 128 }
  0x22   : > { %s195_s28 = sshll.u32 %s194_s24, 4  ;;  %s196_s28 = int_to_ptr.hbm [resolvable:$true] %s195_s28 }
  0x23   : > { %s169_s5 = sshll.u32 %s1348_s1, 4  ;;  %s882_s20 = sshra.s32 %s196_s28, 4  ;;  %s170_s5 = int_to_ptr.hbm [resolvable:$true] %s169_s5  ;;  %s883_s20 = int_to_ptr.hbm [resolvable:$true] %s882_s20 }
  0x24   : > { %s884_s23 = scalar_lea.hbm %s883_s20, 16  ;;  %p890_p13 = scmp.lt.s32.totalorder %s883_s20, %s1346_s2 }
  0x25   : > { %p885_p7 = scmp.ne.s32.totalorder %s883_s20, %s884_s23  ;;  %p891_p0 = scmp.lt.s32.totalorder %s889_s8, %s884_s23 }
  0x27   : > { %p887_p11 = pnand %p886_p9, %p885_p7  ;;  %p892_p3 = por %p891_p0, %p890_p13 }
  0x29   : > { %p888_p12 = pneg %p887_p11 }
  0x2b   : > { %p893_p1 = pnand %p892_p3, %p888_p12 }
  0x2d   : > { %896 = shalt.err (!%p893_p1)
}
  0x2e   : > { %s1349_s11 = smov 8   ;;  %s1350_s0 = smov 128  }
  0x2f   : > { %798 = dma.hbm_to_vmem [thread:$0]  (!%p1169_p2), %s196_s28, 256, %s198_s27, %s1176_s6, %s1350_s0, %s1350_s0, %s1349_s11  }
  0x30   : > { %s1051_s24 = smov [#allocation5]   ;;  %s1351_s14 = sshll.u32 %s1046_s18, 4 }
  0x31   : > { %s171_s25 = sshll.u32 %s1051_s24, 4  ;;  %s216_s8 = scalar_lea.hbm %s1328_s3, %s1351_s14  ;;  %s172_s25 = int_to_ptr.vmem [resolvable:$true] %s171_s25 }
  0x32   : > { %794 = dma.hbm_to_vmem [thread:$0]  (!%p1128_p10), %s170_s5, 256, %s172_s25, [#allocation6], %s1350_s0, %s1350_s0, %s1349_s11  }
  0x33   : > { %s217_s12 = sshll.u32 %s216_s8, 4  ;;  %s211_s1 = scalar_lea.vmem [#allocation8], %s1158_s13  ;;  %s218_s12 = int_to_ptr.hbm [resolvable:$true] %s217_s12 }
  0x34   : > { %s219_s2 = sshll.u32 %s211_s1, 4  ;;  %s942_s9 = sshra.s32 %s218_s12, 4  ;;  %s220_s2 = int_to_ptr.vmem [resolvable:$true] %s219_s2  ;;  %s943_s9 = int_to_ptr.hbm [resolvable:$true] %s942_s9 }
  0x35   : > { %s944_s27 = scalar_lea.hbm %s943_s9, 16  ;;  %s949_s29 = scalar_lea.hbm %s1328_s3, 128 }
  0x36   : > { %p945_p1 = scmp.ne.s32.totalorder %s943_s9, %s944_s27  ;;  %p950_p10 = scmp.lt.s32.totalorder %s943_s9, %s1328_s3 }
  0x37   : > { %p951_p12 = scmp.lt.s32.totalorder %s949_s29, %s944_s27 }
  0x38   : > { %p947_p7 = pnand %p945_p1, %p886_p9 }
  0x39   : > { %p952_p13 = por %p951_p12, %p950_p10 }
  0x3a   : > { %p948_p11 = pneg %p947_p7 }
  0x3c   : > { %p953_p0 = pnand %p952_p13, %p948_p11 }
  0x3e   : > { %956 = shalt.err (!%p953_p0)
}
  0x3f   : > { %801 = dma.hbm_to_vmem [thread:$0]  (!%p1169_p2), %s218_s12, 256, %s220_s2, %s1176_s6, %s1350_s0, %s1350_s0, %s1349_s11  }
  0x40   : > { %231 = sbr.rel (%p1120_p8) target bundleno = 602 (0x25a), region = 36  ;;  %p1352_p9 = scmp.eq.s32.totalorder (!%p1120_p8), %s1098_s19, 0 }
  0x45   : > { %1017 = dma.done.wait (%p1352_p9), [#allocation3], 256   ;;  %p1353_p3 = pmov %p1352_p9 }
  0x47   : > { %1019 = vsyncadd (%p1353_p3), [#allocation3], 4294967040  ;;  %p1354_p1 = pmov %p1353_p3 }
  0x49   : > { %1021 = dma.done.wait (%p1354_p1), [#allocation6], 256   ;;  %p1355_p7 = pmov %p1354_p1 }
  0x4a   : > { %s243_s1 = sand.u32 1, %s1098_s19   ;;  %s1233_s0 = sand.u32 1, %s1038_s16  }
  0x4b   : > { %1023 = vsyncadd (%p1355_p7), [#allocation6], 4294967040  ;;  %s735_s2 = sshll.u32 %s1233_s0, 4  ;;  %s244_s26 = scalar_lea.sflag [#allocation3], %s243_s1 }
  0x4c   : > { %s247_s5 = scalar_lea.vmem [#allocation7], %s735_s2 }
  0x4d   : > { %1025 = dma.done.wait (%p1107_p4), %s244_s26, 512  }
  0x4e   : > { %1027 = vsyncadd (%p1107_p4), %s244_s26, 4294966784  ;;  %v295_v0 = vld [vmem:[#allocation5 + $0x8] sm:$0xff]  ;;  %v294_v1 = vld [vmem:[#allocation5] sm:$0xff]  ;;  %vm302_vm0 = vcmask 130048   ;;  %s257_s6 = scalar_lea.vmem [#allocation8], %s735_s2  ;;  %s737_s21 = sshll.u32 %s1233_s0, 1 }
  0x4f   : > { %347 = vmatpush.msra.mxu0 %v295_v0  ;;  %v1240_v2 = vld [vmem:[%s247_s5] sm:$0xff]  ;;  %v1242_v3 = vld [vmem:[%s247_s5 + $0x8] sm:$0xff]  ;;  %766 = vmatpush.msra.mxu3 %v295_v0  ;;  %s759_s9 = sshll.u32 %s1098_s19, 1  ;;  %s287_s25 = scalar_lea.vmem [#allocation9], %s737_s21  ;;  %vm593_vm9 = vcmask 1040384  }
  0x50   : > { %v1244_v4 = vld [vmem:[%s257_s6 + $0x8] sm:$0xff]  ;;  %v1248_v6 = vld [vmem:[%s257_s6] sm:$0xff]  ;;  %764 = vmatpush.msra.mxu1 %v295_v0  ;;  %v297_v7 = vmul.f32 %v1242_v3, %v1242_v3  ;;  %765 = vmatpush.msra.mxu2 %v295_v0  ;;  %v296_v11 = vmul.f32 %v1240_v2, %v1240_v2  ;;  %s607_s11 = scalar_lea.hbm %s1329_s4, %s759_s9  ;;  %s609_s23 = sshll.u32 %s287_s25, 4  ;;  %s610_s23 = int_to_ptr.vmem [resolvable:$true] %s609_s23 }
  0x51   : > { %v299_v5 = vmul.f32 %v1244_v4, %v1244_v4  ;;  %348 = vmatpush.msra.mxu0 %v294_v1  ;;  %769 = vmatpush.msra.mxu3 %v294_v1  ;;  %v298_v8 = vmul.f32 %v1248_v6, %v1248_v6  ;;  %v300_v9 = vmul.f32 %v1248_v6, %v1240_v2  ;;  %v292_v16 = vld [vmem:[#allocation2] sm:$0xff]  ;;  %v293_v20 = vld [vmem:[#allocation2 + $0x8] sm:$0xff]  ;;  %s611_s12 = sshll.u32 %s607_s11, 4  ;;  %s597_s28 = scalar_lea.sflag [#allocation4], %s1233_s0  ;;  %s612_s12 = int_to_ptr.hbm [resolvable:$true] %s611_s12 }
  0x52   : > { %738 = vmatmul.msk.f32.vlgmr.msra.gmra.mxu0 %vm302_vm0, %v1240_v2  ;;  %767 = vmatpush.msra.mxu1 %v294_v1  ;;  %v301_v10 = vmul.f32 %v1244_v4, %v1242_v3  ;;  %s986_s24 = sshra.s32 %s612_s12, 4  ;;  %s992_s20 = scalar_lea.hbm %s1329_s4, 16  ;;  %s987_s24 = int_to_ptr.hbm [resolvable:$true] %s986_s24 }
  0x53   : > { %745 = vmatmul.msk.f32.vlgmr.msra.gmra.mxu3 %vm302_vm0, %v299_v5  ;;  %768 = vmatpush.msra.mxu2 %v294_v1  ;;  %s988_s19 = scalar_lea.hbm %s987_s24, 2  ;;  %p993_p11 = scmp.lt.s32.totalorder %s987_s24, %s1329_s4 }
  0x54   : > { %743 = vmatmul.msk.f32.vlgmr.msra.gmra.mxu1 %vm302_vm0, %v297_v7  ;;  %744 = vmatmul.msk.f32.vlgmr.msra.gmra.mxu2 %vm302_vm0, %v298_v8  ;;  %p989_p4 = scmp.ne.s32.totalorder %s987_s24, %s988_s19  ;;  %p994_p10 = scmp.lt.s32.totalorder %s992_s20, %s988_s19 }
  0x56   : > { %p990_p8 = pnand %p989_p4, %p1152_p5  ;;  %p995_p12 = por %p994_p10, %p993_p11 }
  0x58   : > { %p991_p2 = pneg %p990_p8 }
  0x5a   : > { %739 = vmatmul.msk.f32.gmra.mxu0 %vm302_vm0, %v1242_v3  ;;  %p996_p13 = pnand %p995_p12, %p991_p2 }
  0x5b   : > { %746 = vmatmul.msk.f32.gmra.mxu3 %vm302_vm0, %v300_v9 }
  0x62   : > { %740 = vmatmul.msk.f32.gmra.mxu0 %vm302_vm0, %v1248_v6 }
  0x63   : > { %747 = vmatmul.msk.f32.gmra.mxu3 %vm302_vm0, %v301_v10 }
  0x6a   : > { %741 = vmatmul.msk.f32.gmra.mxu0 %vm302_vm0, %v1244_v4 }
  0x72   : > { %742 = vmatmul.msk.f32.gmra.mxu0 %vm302_vm0, %v296_v11 }
  0xcf   : > { %v350_v12 = vpop.f32.mrf.mxu0 }
  0xd1   : > { %v365_v13 = vpop.f32.mrf.mxu1 }
  0xd2   : > { %446 = vmatpush.msrb.mxu3 %v365_v13 }
  0xd6   : > { %v371_v14 = vpop.f32.mrf.mxu3 }
  0xd7   : > { %v353_v15 = vpop.f32.mrf.mxu0  ;;  %v368_v17 = vpop.f32.mrf.mxu2 }
  0xd8   : > { %400 = vmatpush.msrb.mxu1 %v353_v15 }
  0xda   : > { %401 = vmatpush.msrb.mxu1 %v350_v12 }
  0xdb   : > { %748 = vmatmul.msk.f32.vlgmr.msrb.gmra.mxu1 %vm302_vm0, %v292_v16 }
  0xdc   : > { %469 = vmatpush.msra.mxu1 %v371_v14 }
  0xde   : > { %470 = vmatpush.msra.mxu1 %v368_v17  ;;  %v374_v19 = vpop.f32.mrf.mxu3 }
  0xdf   : > { %v356_v18 = vpop.f32.mrf.mxu0 }
  0xe3   : > { %749 = vmatmul.msk.f32.gmra.mxu1 %vm302_vm0, %v293_v20 }
  0xe6   : > { %v377_v22 = vpop.f32.mrf.mxu3 }
  0xe7   : > { %v359_v21 = vpop.f32.mrf.mxu0 }
  0xe8   : > { %423 = vmatpush.msrb.mxu2 %v359_v21 }
  0xea   : > { %424 = vmatpush.msrb.mxu2 %v356_v18 }
  0xeb   : > { %750 = vmatmul.msk.f32.vlgmr.msrb.gmra.mxu2 %vm302_vm0, %v292_v16  ;;  %754 = vmatmul.msk.f32.vlgmr.msra.gmra.mxu1 %vm302_vm0, %v292_v16 }
  0xec   : > { %492 = vmatpush.msra.mxu2 %v377_v22 }
  0xee   : > { %493 = vmatpush.msra.mxu2 %v374_v19 }
  0xef   : > { %v362_v23 = vpop.f32.mrf.mxu0 }
  0xf0   : > { %447 = vmatpush.msrb.mxu3 %v362_v23  ;;  %v563_v23 = vsub.f32 %v1240_v2, %v1248_v6 }
  0xf1   : > { %752 = vmatmul.msk.f32.vlgmr.msrb.gmra.mxu3 %vm302_vm0, %v292_v16 }
  0xf3   : > { %751 = vmatmul.msk.f32.gmra.mxu2 %vm302_vm0, %v293_v20  ;;  %755 = vmatmul.msk.f32.gmra.mxu1 %vm302_vm0, %v293_v20 }
  0xf9   : > { %753 = vmatmul.msk.f32.gmra.mxu3 %vm302_vm0, %v293_v20 }
  0xfb   : > { %756 = vmatmul.msk.f32.vlgmr.msra.gmra.mxu2 %vm302_vm0, %v292_v16 }
 0x103   : > { %757 = vmatmul.msk.f32.gmra.mxu2 %vm302_vm0, %v293_v20 }
 0x158   : > { %v403_v24 = vpop.f32.mrf.mxu1 }
 0x159   : > { %v501_v29 = vmul.f32 %v403_v24, %v403_v24 }
 0x160   : > { %v406_v25 = vpop.f32.mrf.mxu1 }
 0x161   : > { %v502_v40 = vmul.f32 %v406_v25, %v406_v25 }
 0x168   : > { %v472_v27 = vpop.f32.mrf.mxu1 }
 0x16e   : > { %v426_v26 = vpop.f32.mrf.mxu2 }
 0x16f   : > { %v503_v28 = vmul.f32 %v426_v26, %v426_v26  ;;  %v505_v52 = vmul.f32 %v426_v26, %v403_v24  ;;  %v564_v24 = vsub.f32 %v1242_v3, %v1244_v4 }
 0x170   : > { %v475_v36 = vpop.f32.mrf.mxu1 }
 0x171   : > { %v509_v30 = vsub.f32 %v472_v27, %v503_v28  ;;  %v523_v32 = vadd.f32 %v503_v28, %v501_v29  ;;  %v513_v63 = vmul.f32 2.0, %v505_v52 }
 0x173   : > { %v525_v37 = vadd.f32 0.0001, %v523_v32  ;;  %v515_v12 = vadd.f32 0.0001, %v513_v63  ;;  %v577_v32 = vmul.f32 %v563_v23, %v563_v23 }
 0x174   : > { %v449_v31 = vpop.f32.mrf.mxu3 }
 0x175   : > { %v507_v33 = vsub.f32 %v449_v31, %v501_v29 }
 0x176   : > { %v429_v34 = vpop.f32.mrf.mxu2 }
 0x177   : > { %v527_v35 = vadd.f32 %v509_v30, %v507_v33  ;;  %v504_v39 = vmul.f32 %v429_v34, %v429_v34  ;;  %v506_v54 = vmul.f32 %v429_v34, %v406_v25  ;;  %v578_v33 = vmul.f32 %v564_v24, %v564_v24 }
 0x179   : > { %v529_v38 = vadd.f32 0.0009, %v527_v35  ;;  %v510_v42 = vsub.f32 %v475_v36, %v504_v39  ;;  %v524_v44 = vadd.f32 %v504_v39, %v502_v40  ;;  %v514_v8 = vmul.f32 2.0, %v506_v54 }
 0x17a   : > { %v579_v35 = vsel %vm302_vm0, %v577_v32, 0.0  ;;  %v580_v2 = vsel %vm302_vm0, %v578_v33, 0.0 }
 0x17b   : > { %v531_v41 = vmul.f32 %v529_v38, %v525_v37  ;;  %v526_v48 = vadd.f32 0.0001, %v524_v44  ;;  %v516_v19 = vadd.f32 0.0001, %v514_v8  ;;  %v581_v6 = vadd.f32 %v580_v2, %v579_v35 }
 0x17c   : > { %v452_v43 = vpop.f32.mrf.mxu3 }
 0x17d   : > { %848 = vrcp.f32 %v531_v41  ;;  %v508_v45 = vsub.f32 %v452_v43, %v502_v40  ;;  %v542_v0 = vand.u32 2147483647, %v531_v41  ;;  %v544_v1 = vand.u32 2147483648, %v531_v41 }
 0x17e   : > { %v495_v46 = vpop.f32.mrf.mxu2  ;;  %vm538_vm2 = vweird.f32 %v531_v41 }
 0x17f   : > { %v528_v47 = vadd.f32 %v510_v42, %v508_v45  ;;  %v511_v55 = vsub.f32 %v495_v46, %v505_v52  ;;  %vm543_vm4 = vcmp.eq.f32.partialorder %v542_v0, 8.507059e+37  ;;  %v545_v13 = vor.u32 1.1754944e-38, %v544_v1 }
 0x181   : > { %v530_v49 = vadd.f32 0.0009, %v528_v47  ;;  %v517_v60 = vmul.f32 2.0, %v511_v55 }
 0x183   : > { %v849_v50 = vpop.eup %848  ;;  %v532_v51 = vmul.f32 %v530_v49, %v526_v48  ;;  %v519_v9 = vadd.f32 0.0009, %v517_v60 }
 0x184   : > { %v534_v53 = vmul.f32 %v849_v50, %v531_v41  ;;  %vm539_vm1 = vweird.f32 %v849_v50 }
 0x185   : > { %850 = vrcp.f32 %v532_v51  ;;  %vm540_vm3 = vmor %vm538_vm2, %vm539_vm1  ;;  %v559_v14 = vand.u32 2147483648, %v532_v51  ;;  %v557_v17 = vand.u32 2147483647, %v532_v51  ;;  %v521_v20 = vmul.f32 %v519_v9, %v515_v12 }
 0x186   : > { %v498_v56 = vpop.f32.mrf.mxu2  ;;  %v535_v57 = vsub.f32 1.0, %v534_v53  ;;  %vm553_vm6 = vweird.f32 %v532_v51 }
 0x187   : > { %v512_v58 = vsub.f32 %v498_v56, %v506_v54  ;;  %v560_v22 = vor.u32 1.1754944e-38, %v559_v14  ;;  %vm558_vm8 = vcmp.eq.f32.partialorder %v557_v17, 8.507059e+37 }
 0x188   : > { %v536_v59 = vmul.f32 %v849_v50, %v535_v57 }
 0x189   : > { %v518_v5 = vmul.f32 2.0, %v512_v58 }
 0x18a   : > { %v537_v61 = vadd.f32 %v849_v50, %v536_v59 }
 0x18b   : > { %v851_v62 = vpop.eup %850  ;;  %v520_v15 = vadd.f32 0.0009, %v518_v5 }
 0x18c   : > { %v549_v7 = vmul.f32 %v851_v62, %v532_v51  ;;  %v541_v10 = vsel %vm540_vm3, %v849_v50, %v537_v61  ;;  %vm554_vm5 = vweird.f32 %v851_v62 }
 0x18d   : > { %v546_v18 = vsel %vm543_vm4, %v545_v13, %v541_v10  ;;  %vm555_vm7 = vmor %vm553_vm6, %vm554_vm5  ;;  %v522_v25 = vmul.f32 %v520_v15, %v516_v19 }
 0x18e   : > { %v550_v11 = vsub.f32 1.0, %v549_v7  ;;  %v547_v26 = vmul.f32 %v546_v18, %v521_v20 }
 0x190   : > { %v551_v16 = vmul.f32 %v851_v62, %v550_v11  ;;  %v565_v30 = vsel %vm302_vm0, %v547_v26, 0.0 }
 0x192   : > { %v552_v21 = vadd.f32 %v851_v62, %v551_v16 }
 0x194   : > { %v556_v27 = vsel %vm555_vm7, %v851_v62, %v552_v21 }
 0x195   : > { %v561_v28 = vsel %vm558_vm8, %v560_v22, %v556_v27 }
 0x196   : > { %v562_v29 = vmul.f32 %v561_v28, %v522_v25 }
 0x198   : > { %v566_v31 = vsel %vm302_vm0, %v562_v29, 0.0 }
 0x199   : > { %v567_v34 = vadd.f32 %v566_v31, %v565_v30 }
 0x19b   : > { %568 = vadd.xlane.f32.xlu0 %v567_v34 }
 0x1a3   : > { %582 = vadd.xlane.f32.xlu0 %v581_v6 }
 0x20e   : > { %v569_v3 = vpop.xlane.xlu0 %568 }
 0x20f   : > { %v570_v4 = vrot.slane %v569_v3, 4 }
 0x211   : > { %v571_v36 = vadd.f32 %v570_v4, %v569_v3 }
 0x213   : > { %v572_v37 = vrot.slane %v571_v36, 2 }
 0x215   : > { %v573_v38 = vadd.f32 %v572_v37, %v571_v36 }
 0x216   : > { %v583_v39 = vpop.xlane.xlu0 %582 }
 0x217   : > { %v584_v40 = vrot.slane %v583_v39, 4  ;;  %v574_v41 = vrot.slane %v573_v38, 1 }
 0x219   : > { %v585_v42 = vadd.f32 %v584_v40, %v583_v39  ;;  %v575_v43 = vadd.f32 %v574_v41, %v573_v38 }
 0x21b   : > { %v586_v44 = vrot.slane %v585_v42, 2  ;;  %770 = vpush %v575_v43 }
 0x21d   : > { %v587_v45 = vadd.f32 %v586_v44, %v585_v42 }
 0x21f   : > { %v588_v46 = vrot.slane %v587_v45, 1 }
 0x221   : > { %v589_v47 = vadd.f32 %v588_v46, %v587_v45 }
 0x223   : > { %772 = vpush %v589_v47 }
 0x24c   : > { %s771_s8 = spop %770 }
 0x24d   : > { %v591_v48 = vstv %s771_s8 }
 0x254   : > { %s773_s27 = spop %772 }
 0x255   : > { %v592_v49 = vstv %s773_s27 }
 0x256   : > { %v594_v50 = vsel %vm593_vm9, %v591_v48, %v592_v49 }
 0x257   : > { %595 = vst [vmem:[%s287_s25] sm:$0x3] %v594_v50 }
 0x258   : > { %999 = shalt.err (!%p996_p13)
}
 0x259   : > { %786 = dma.vmem_to_hbm [thread:$0]  (%p1152_p5), %s610_s23, 32, %s612_s12, %s597_s28  }
 0x25a PF: > { %p811_p0 = scmp.ge.s32.totalorder %s1046_s18, 2  ;;  %s623_s0 = sand.u32 1, %s1034_s15  }
 0x25b   : > { %s624_s26 = scalar_lea.sflag [#allocation4], %s623_s0 }
 0x25c   : > { %p803_p9 = pnand %p811_p0, %p1112_p6 }
 0x25e   : > { %p804_p3 = pneg %p803_p9 }
 0x260   : > { %1029 = dma.done.wait (%p804_p3), %s624_s26, 32  }
 0x261   : > { %1031 = vsyncadd (%p804_p3), %s624_s26, 4294967264  ;;  %s1356_s5 = sld [smem:[#allocation14_spill]]  ;;  %p16_p1 = scmp.ge.s32.totalorder %s1133_s30, 10  }
 0x262   : > { %s1357_s15 = smov %s1038_s16  ;;  %s1358_s16 = smov %s1042_s17 }
 0x263   : > { %s1360_s18 = smov %s1133_s30  ;;  %18 = sbr.rel (!%p16_p1) target bundleno = 9 (0x9), region = 99 }
 0x267   : > { %s1359_s17 = smov %s1356_s5 }
 0x268   :  { %630 = vsyncpa [#allocation3], 1 }
 0x269   :  { %632 = vsyncpa [#allocation3 + $0x1], 1 }
 0x26a   :  { %633 = vsyncpa [#allocation6], 1 }
 0x26b   :  { %634 = vsyncpa [#allocation4], 1 }
 0x26c   :  { %636 = vsyncpa [#allocation4 + $0x1], 1 }

</bundles_post_ra>
